<compile_context>
chip_gen: v6e
topology: v6e:2x2x1
jax: 0.10.0
libtpu: 0.0.40
codegen_flags: <defaults>
</compile_context>

<pallas_src>
import jax
import jax.numpy as jnp
from jax import lax
from jax.experimental import pallas as pl
from jax.experimental.pallas import tpu as pltpu

INPUT_DIM = 64
HIDDEN = 32
MAX_BATCH_TILE = 8192   # 8192x64 f32 x 2 buffers (lane-padded) = 8 MiB of VMEM
_SUBLANES = 8


def emotion_regressor_kernel(x_ref, w1_ref, b1_ref, w2r_ref, b2_ref, o_ref):
    # Layer 1: hidden = ReLU(x @ W1 + b1)              (tb, 32)  MXU + VPU
    h = jnp.dot(x_ref[...], w1_ref[...], preferred_element_type=jnp.float32)
    h = jnp.maximum(h + b1_ref[...], 0.0)
    # Layer 2, lane-dense: y = w2^T (1,32) . h^T  ->   (1, tb)
    # trans-B dot_general (same pattern as q @ k^T in flash attention); the
    # batch axis ends up on lanes, so output stores are full-width.
    y = lax.dot_general(
        w2r_ref[...], h,
        dimension_numbers=(((1,), (1,)), ((), ())),
        preferred_element_type=jnp.float32,
    )
    out_row = jax.nn.sigmoid(y + b2_ref[...])          # (1, tb), EUP exp
    # Scatter the (1, tb) row into the (8, tb//8) lane-dense output block.
    rows = o_ref.shape[1]
    for s in range(_SUBLANES):
        o_ref[s:s + 1, :] = out_row[:, s * rows:(s + 1) * rows]


def _round_up(n, m):
    return ((n + m - 1) // m) * m


def _pick_tile(batch):
    b8 = _round_up(batch, _SUBLANES)
    if b8 <= 512:
        return b8                                   # single small tile
    # >= 2 grid steps when possible (v7x megacore), capped so the
    # double-buffered x stream stays well inside every scoped-VMEM default.
    return min(MAX_BATCH_TILE, _round_up(pl.cdiv(b8, 2), 256))


def emotion_regressor(x, w1, b1, w2, b2):
    """x: (B, 64) f32 -> (B, 1) f32. Fused Linear->ReLU->Linear->Sigmoid."""
    B, D = x.shape
    H = w1.shape[1]

    tb = _pick_tile(B)
    b_pad = _round_up(B, tb)
    if b_pad != B:
        # Padded rows run sigmoid on zeros -- harmless, sliced off below.
        x = jnp.pad(x, ((0, b_pad - B), (0, 0)))
    num_tiles = b_pad // tb
    rows = tb // _SUBLANES

    w2r = w2.reshape(1, H)   # (32,1) -> (1,32): row-major reshape == transpose

    cost = pl.CostEstimate(
        flops=2 * b_pad * D * H + 2 * b_pad * H,
        transcendentals=b_pad,                        # one sigmoid exp per row
        bytes_accessed=b_pad * D * 4 + b_pad * 4 + (D * H + H + H + 1) * 4,
    )

    out = pl.pallas_call(
        emotion_regressor_kernel,
        out_shape=jax.ShapeDtypeStruct((num_tiles * _SUBLANES, rows), jnp.float32),
        grid=(num_tiles,),
        in_specs=[
            # x: streamed per batch tile, double-buffered by Pallas.
            pl.BlockSpec((tb, D), lambda i: (i, 0)),
            # Weights/biases: constant block index -> fetched once, resident.
            pl.BlockSpec((D, H), lambda i: (0, 0)),   # w1
            pl.BlockSpec((1, H), lambda i: (0, 0)),   # b1
            pl.BlockSpec((1, H), lambda i: (0, 0)),   # w2^T
            pl.BlockSpec((1, 1), lambda i: (0, 0)),   # b2
        ],
        # Lane-dense output: (8, tb//8) block; second-minor=8, minor=full dim.
        out_specs=pl.BlockSpec((_SUBLANES, rows), lambda i: (i, 0)),
        compiler_params=pltpu.CompilerParams(
            dimension_semantics=("parallel",),        # megacore sharding on v7x
        ),
        cost_estimate=cost,
    )(x, w1, b1, w2r, b2)

    # (num_tiles*8, tb//8) flattens row-major exactly into global batch order:
    # flat index = (i*8+s)*rows + c = i*tb + s*rows + c.
    return out.reshape(b_pad, 1)[:B]


def init_params(key, input_dim=INPUT_DIM, hidden=HIDDEN):
    """Deterministic init mirroring nn.Linear's U(-1/sqrt(fan_in), +1/sqrt(fan_in))."""
    k1, k2, k3, k4 = jax.random.split(key, 4)
    bound1 = 1.0 / jnp.sqrt(input_dim)
    bound2 = 1.0 / jnp.sqrt(hidden)
    w1 = jax.random.uniform(k1, (input_dim, hidden), jnp.float32, -bound1, bound1)
    b1 = jax.random.uniform(k2, (1, hidden), jnp.float32, -bound1, bound1)
    w2 = jax.random.uniform(k3, (hidden, 1), jnp.float32, -bound2, bound2)
    b2 = jax.random.uniform(k4, (1, 1), jnp.float32, -bound2, bound2)
    return w1, b1, w2, b2


def _reference(x, w1, b1, w2, b2):
    return jax.nn.sigmoid(jnp.maximum(x @ w1 + b1, 0.0) @ w2 + b2)


if __name__ == "__main__":
    key = jax.random.PRNGKey(0)
    k_x, k_p, k_x2 = jax.random.split(key, 3)

    w1, b1, w2, b2 = init_params(k_p, INPUT_DIM, HIDDEN)

    # Small-batch check (single tile, rows=1 path).
    batch = 8
    x = jax.random.normal(k_x, (batch, INPUT_DIM), jnp.float32)
    out = jax.block_until_ready(emotion_regressor(x, w1, b1, w2, b2))
    ref = _reference(x, w1, b1, w2, b2)
    assert out.shape == (batch, 1)
    assert jnp.allclose(out, ref, atol=1e-5, rtol=1e-5)

    # Ragged multi-tile check (exercises grid=2, resident weights, last-tile
    # padding, and the lane-dense output de-flattening).
    batch2 = 2500
    x2 = jax.random.normal(k_x2, (batch2, INPUT_DIM), jnp.float32)
    out2 = jax.block_until_ready(emotion_regressor(x2, w1, b1, w2, b2))
    ref2 = _reference(x2, w1, b1, w2, b2)
    assert out2.shape == (batch2, 1)
    assert jnp.allclose(out2, ref2, atol=1e-5, rtol=1e-5)

    print("KERNEL_OK")
</pallas_src>

<mosaic_0001>
module attributes {stable_mosaic.version = 11 : i64} {
  func.func @emotion_regressor_kernel(%arg0: i32, %arg1: memref<8x64xf32, #tpu.memory_space<vmem>>, %arg2: memref<64x32xf32, #tpu.memory_space<vmem>>, %arg3: memref<1x32xf32, #tpu.memory_space<vmem>>, %arg4: memref<1x32xf32, #tpu.memory_space<vmem>>, %arg5: memref<1x1xf32, #tpu.memory_space<vmem>>, %arg6: memref<8x1xf32, #tpu.memory_space<vmem>>) attributes {dimension_semantics = [#tpu.dimension_semantics<parallel>], iteration_bounds = array<i64: 1>, scalar_prefetch = 0 : i64, scratch_operands = 0 : i64, tpu.core_type = #tpu.core_type<tc>, window_params = [{transform_indices = @transform_0, window_bounds = array<i64: 8, 64>}, {pipeline_mode = #tpu.pipeline_mode<synchronous>, transform_indices = @transform_1, window_bounds = array<i64: 64, 32>}, {pipeline_mode = #tpu.pipeline_mode<synchronous>, transform_indices = @transform_2, window_bounds = array<i64: 1, 32>}, {pipeline_mode = #tpu.pipeline_mode<synchronous>, transform_indices = @transform_3, window_bounds = array<i64: 1, 32>}, {pipeline_mode = #tpu.pipeline_mode<synchronous>, transform_indices = @transform_4, window_bounds = array<i64: 1, 1>}, {transform_indices = @transform_5, window_bounds = array<i64: 8, 1>}]} {
    %c0 = arith.constant 0 : index
    %c0_0 = arith.constant 0 : index
    %0 = vector.load %arg1[%c0, %c0_0] : memref<8x64xf32, #tpu.memory_space<vmem>>, vector<8x64xf32>
    %c0_1 = arith.constant 0 : index
    %c0_2 = arith.constant 0 : index
    %1 = vector.load %arg2[%c0_1, %c0_2] : memref<64x32xf32, #tpu.memory_space<vmem>>, vector<64x32xf32>
    %cst = arith.constant dense<0.000000e+00> : vector<8x32xf32>
    %2 = tpu.matmul %0, %1, %cst {dimension_numbers = #tpu.dot_dimension_numbers<[1], [0], [0], [1], [0, 0, 1, 1], [], []>} : vector<8x64xf32>, vector<64x32xf32>, vector<8x32xf32> -> vector<8x32xf32>
    %c0_3 = arith.constant 0 : index
    %c0_4 = arith.constant 0 : index
    %3 = vector.load %arg3[%c0_3, %c0_4] : memref<1x32xf32, #tpu.memory_space<vmem>>, vector<1x32xf32>
    %4 = vector.broadcast %3 : vector<1x32xf32> to vector<8x32xf32>
    %5 = arith.addf %2, %4 : vector<8x32xf32>
    %cst_5 = arith.constant 0.000000e+00 : f32
    %6 = vector.broadcast %cst_5 : f32 to vector<8x32xf32>
    %7 = arith.maximumf %5, %6 : vector<8x32xf32>
    %c0_6 = arith.constant 0 : index
    %c0_7 = arith.constant 0 : index
    %8 = vector.load %arg4[%c0_6, %c0_7] : memref<1x32xf32, #tpu.memory_space<vmem>>, vector<1x32xf32>
    %cst_8 = arith.constant dense<0.000000e+00> : vector<1x8xf32>
    %9 = tpu.matmul %8, %7, %cst_8 {dimension_numbers = #tpu.dot_dimension_numbers<[1], [1], [0], [0], [0, 0, 1, 0], [], []>} : vector<1x32xf32>, vector<8x32xf32>, vector<1x8xf32> -> vector<1x8xf32>
    %c0_9 = arith.constant 0 : index
    %c0_10 = arith.constant 0 : index
    %10 = vector.load %arg5[%c0_9, %c0_10] : memref<1x1xf32, #tpu.memory_space<vmem>>, vector<1x1xf32>
    %11 = vector.broadcast %10 : vector<1x1xf32> to vector<1x8xf32>
    %12 = arith.addf %9, %11 : vector<1x8xf32>
    %13 = arith.negf %12 : vector<1x8xf32>
    %14 = math.exp %13 : vector<1x8xf32>
    %cst_11 = arith.constant 1.000000e+00 : f32
    %15 = vector.broadcast %cst_11 : f32 to vector<1x8xf32>
    %16 = arith.addf %15, %14 : vector<1x8xf32>
    %17 = arith.divf %15, %16 : vector<1x8xf32>
    %18 = vector.extract_strided_slice %17 {offsets = [0, 0], sizes = [1, 1], strides = [1, 1]} : vector<1x8xf32> to vector<1x1xf32>
    %c0_12 = arith.constant 0 : index
    %c0_13 = arith.constant 0 : index
    %19 = vector.load %arg6[%c0_12, %c0_13] : memref<8x1xf32, #tpu.memory_space<vmem>>, vector<1x1xf32>
    tpu.vector_store %arg6[%c0_12, %c0_13], %18 {strides = array<i32>} : memref<8x1xf32, #tpu.memory_space<vmem>>, vector<1x1xf32>,
    %20 = vector.extract_strided_slice %17 {offsets = [0, 1], sizes = [1, 1], strides = [1, 1]} : vector<1x8xf32> to vector<1x1xf32>
    %c1 = arith.constant 1 : index
    %c0_14 = arith.constant 0 : index
    %21 = vector.load %arg6[%c1, %c0_14] : memref<8x1xf32, #tpu.memory_space<vmem>>, vector<1x1xf32>
    tpu.vector_store %arg6[%c1, %c0_14], %20 {strides = array<i32>} : memref<8x1xf32, #tpu.memory_space<vmem>>, vector<1x1xf32>,
    %22 = vector.extract_strided_slice %17 {offsets = [0, 2], sizes = [1, 1], strides = [1, 1]} : vector<1x8xf32> to vector<1x1xf32>
    %c2 = arith.constant 2 : index
    %c0_15 = arith.constant 0 : index
    %23 = vector.load %arg6[%c2, %c0_15] : memref<8x1xf32, #tpu.memory_space<vmem>>, vector<1x1xf32>
    tpu.vector_store %arg6[%c2, %c0_15], %22 {strides = array<i32>} : memref<8x1xf32, #tpu.memory_space<vmem>>, vector<1x1xf32>,
    %24 = vector.extract_strided_slice %17 {offsets = [0, 3], sizes = [1, 1], strides = [1, 1]} : vector<1x8xf32> to vector<1x1xf32>
    %c3 = arith.constant 3 : index
    %c0_16 = arith.constant 0 : index
    %25 = vector.load %arg6[%c3, %c0_16] : memref<8x1xf32, #tpu.memory_space<vmem>>, vector<1x1xf32>
    tpu.vector_store %arg6[%c3, %c0_16], %24 {strides = array<i32>} : memref<8x1xf32, #tpu.memory_space<vmem>>, vector<1x1xf32>,
    %26 = vector.extract_strided_slice %17 {offsets = [0, 4], sizes = [1, 1], strides = [1, 1]} : vector<1x8xf32> to vector<1x1xf32>
    %c4 = arith.constant 4 : index
    %c0_17 = arith.constant 0 : index
    %27 = vector.load %arg6[%c4, %c0_17] : memref<8x1xf32, #tpu.memory_space<vmem>>, vector<1x1xf32>
    tpu.vector_store %arg6[%c4, %c0_17], %26 {strides = array<i32>} : memref<8x1xf32, #tpu.memory_space<vmem>>, vector<1x1xf32>,
    %28 = vector.extract_strided_slice %17 {offsets = [0, 5], sizes = [1, 1], strides = [1, 1]} : vector<1x8xf32> to vector<1x1xf32>
    %c5 = arith.constant 5 : index
    %c0_18 = arith.constant 0 : index
    %29 = vector.load %arg6[%c5, %c0_18] : memref<8x1xf32, #tpu.memory_space<vmem>>, vector<1x1xf32>
    tpu.vector_store %arg6[%c5, %c0_18], %28 {strides = array<i32>} : memref<8x1xf32, #tpu.memory_space<vmem>>, vector<1x1xf32>,
    %30 = vector.extract_strided_slice %17 {offsets = [0, 6], sizes = [1, 1], strides = [1, 1]} : vector<1x8xf32> to vector<1x1xf32>
    %c6 = arith.constant 6 : index
    %c0_19 = arith.constant 0 : index
    %31 = vector.load %arg6[%c6, %c0_19] : memref<8x1xf32, #tpu.memory_space<vmem>>, vector<1x1xf32>
    tpu.vector_store %arg6[%c6, %c0_19], %30 {strides = array<i32>} : memref<8x1xf32, #tpu.memory_space<vmem>>, vector<1x1xf32>,
    %32 = vector.extract_strided_slice %17 {offsets = [0, 7], sizes = [1, 1], strides = [1, 1]} : vector<1x8xf32> to vector<1x1xf32>
    %c7 = arith.constant 7 : index
    %c0_20 = arith.constant 0 : index
    %33 = vector.load %arg6[%c7, %c0_20] : memref<8x1xf32, #tpu.memory_space<vmem>>, vector<1x1xf32>
    tpu.vector_store %arg6[%c7, %c0_20], %32 {strides = array<i32>} : memref<8x1xf32, #tpu.memory_space<vmem>>, vector<1x1xf32>,
    return
  }
  func.func @transform_0(%arg0: i32) -> (i32, i32) {
    %c0_i32 = arith.constant 0 : i32
    %c0_i32_0 = arith.constant 0 : i32
    return %arg0, %c0_i32 : i32, i32
  }
  func.func @transform_1(%arg0: i32) -> (i32, i32) {
    %c0_i32 = arith.constant 0 : i32
    %c0_i32_0 = arith.constant 0 : i32
    %c0_i32_1 = arith.constant 0 : i32
    return %c0_i32, %c0_i32_0 : i32, i32
  }
  func.func @transform_2(%arg0: i32) -> (i32, i32) {
    %c0_i32 = arith.constant 0 : i32
    %c0_i32_0 = arith.constant 0 : i32
    %c0_i32_1 = arith.constant 0 : i32
    return %c0_i32, %c0_i32_0 : i32, i32
  }
  func.func @transform_3(%arg0: i32) -> (i32, i32) {
    %c0_i32 = arith.constant 0 : i32
    %c0_i32_0 = arith.constant 0 : i32
    %c0_i32_1 = arith.constant 0 : i32
    return %c0_i32, %c0_i32_0 : i32, i32
  }
  func.func @transform_4(%arg0: i32) -> (i32, i32) {
    %c0_i32 = arith.constant 0 : i32
    %c0_i32_0 = arith.constant 0 : i32
    %c0_i32_1 = arith.constant 0 : i32
    return %c0_i32, %c0_i32_0 : i32, i32
  }
  func.func @transform_5(%arg0: i32) -> (i32, i32) {
    %c0_i32 = arith.constant 0 : i32
    %c0_i32_0 = arith.constant 0 : i32
    return %arg0, %c0_i32 : i32, i32
  }
}

</mosaic_0001>

<bundles_post_ra>
// kernel: tpu_custom_call.1
= control target key start
LH: loop header
LB: loop body
LE: loop exit
PB: predicated region body
PF: predicated region fallthrough
CT: control target
= control target key end

     0   :  { %v297_v0 = vmov 0.0   ;;  %vm298_vm0 = vmmov 0   ;;  %vm38_vm1 = vcmask 523264   ;;  %v299_v10 = vmov 0   ;;  %s302_s16 = smov 125   ;;  %s303_s17 = smov 124   ;;  %s405_s1 = inlined_call_operand.vmem [shape: f32[64,32], index: 1, kind: input, shape index: {}]   ;;  %s406_s0 = inlined_call_operand.vmem [shape: f32[8,64], index: 0, kind: input, shape index: {}]   ;;  %s407_s4 = inlined_call_operand.<no memory space> [shape: f32[1,1], index: 4, kind: input, shape index: {}]   ;;  %s408_s2 = inlined_call_operand.vmem [shape: f32[1,32], index: 2, kind: input, shape index: {}]   ;;  %s409_s3 = inlined_call_operand.vmem [shape: f32[1,32], index: 3, kind: input, shape index: {}]   ;;  %s410_s5 = inlined_call_operand.vmem [shape: f32[8,1], index: 5, kind: output, shape index: {}]  }
   0x1   :  { %258 = vmatprep.subr.mxu0 %v297_v0  ;;  %v30_v1 = vld [vmem:[%s405_s1 + $0x38] sm:$0xff]  ;;  %v29_v2 = vld [vmem:[%s405_s1 + $0x30] sm:$0xff]  ;;  %274 = vmatprep.mubr.msk.f32.mxu0 %vm298_vm0, %v297_v0  ;;  %v28_v3 = vld [vmem:[%s405_s1 + $0x28] sm:$0xff]  ;;  %v10_v11 = vstv %s407_s4  ;;  %vm124_vm2 = vcmask 261120   ;;  %v120_v19 = vlaneseq  ;;  %vm207_vm3 = vcmask 0   ;;  %s301_s4 = smov 127  }
   0x2   :  { %259 = vmatpush3.msra.mxu0 %v30_v1  ;;  %277 = vmatprep.subr.mxu1 %v297_v0  ;;  %v27_v4 = vld [vmem:[%s405_s1 + $0x20] sm:$0xff]  ;;  %v26_v5 = vld [vmem:[%s405_s1 + $0x18] sm:$0xff]  ;;  %v25_v6 = vld [vmem:[%s405_s1 + $0x10] sm:$0xff]  ;;  %11 = vst [vmem:[#allocation2] sm:$0x1] %v10_v11  ;;  %s304_s18 = smov 123  }
   0x3   :  { %260 = vmatprep.subr.mxu0 %v297_v0  ;;  %279 = vmatprep.mubr.msk.f32.mxu1 %vm298_vm0, %v297_v0  ;;  %v24_v7 = vld [vmem:[%s405_s1 + $0x8] sm:$0xff]  ;;  %v23_v8 = vld [vmem:[%s405_s1] sm:$0xff]  ;;  %v121_v20 = vshrl.u32 %v120_v19, 7  ;;  %s305_s19 = smov 122   ;;  %s306_s20 = smov 121  }
   0x4   :  { %261 = vmatpush3.msra.mxu0 %v29_v2  ;;  %v22_v9 = vld [vmem:[%s406_s0] sm:$0xff]  ;;  %292 = vset.pattern.permute.xlu0 %v299_v10 }
   0x5   :  { %262 = vmatprep.subr.mxu0 %v297_v0  ;;  %v242_v13 = vld [vmem:[%s408_s2] ss:$0 sm:$0xff]  ;;  %v122_v21 = vsub.s32 0, %v121_v20  ;;  %s300_s2 = smov 126  }
   0x6   :  { %263 = vmatpush3.msra.mxu0 %v28_v3  ;;  %v113_v18 = vld [vmem:[%s409_s3] sm:$0x1] }
   0x7   :  { %264 = vmatprep.subr.mxu0 %v297_v0 }
   0x8   :  { %265 = vmatpush3.msra.mxu0 %v27_v4 }
   0x9   :  { %266 = vmatprep.subr.mxu0 %v297_v0  ;;  %v114_v12 = vld [vmem:[#allocation2] sm:$0x1] }
   0xa   :  { %267 = vmatpush3.msra.mxu0 %v26_v5  ;;  %117 = vperm.xlu0 %292, %v114_v12  }
   0xb   :  { %268 = vmatprep.subr.mxu0 %v297_v0 }
   0xc   :  { %269 = vmatpush3.msra.mxu0 %v25_v6 }
   0xd   :  { %270 = vmatprep.subr.mxu0 %v297_v0 }
   0xe   :  { %271 = vmatpush3.msra.mxu0 %v24_v7 }
   0xf   :  { %272 = vmatprep.subr.mxu0 %v297_v0 }
  0x10   :  { %273 = vmatpush3.msra.mxu0 %v23_v8 }
  0x11   :  { %275 = vmatmul.mubr.msk.f32.vlgmr.msra.gmra.mxu0 %vm38_vm1, %v22_v9 }
  0x85   :  { %v118_v22 = vpop.permute.xlu0 %117 }
  0x86   :  { %v123_v23 = vrot.slane %v118_v22, %v122_v21 }
  0xd1   :  { %v108_v14 = vpop.f32.mrf.mxu0 }
  0xd2   :  { %v109_v15 = vadd.f32 %v242_v13, %v108_v14 }
  0xd3   :  { %v276_v16 = vpop.f32.mrf.mxu0 }
  0xd4   :  { %v112_v17 = vmax.f32 %v109_v15, 0.0 }
  0xd6   :  { %278 = vmatpush3.xpose.msk.msra.mxu1 %vm124_vm2, %v112_v17 }
  0xd9   :  { %280 = vmatmul.mubr.msk.f32.vlgmr.msra.gmra.mxu1 %vm124_vm2, %v113_v18 }
 0x199   :  { %v197_v24 = vpop.f32.mrf.mxu1 }
 0x19a   :  { %v198_v25 = vadd.f32 %v197_v24, %v123_v23 }
 0x19b   :  { %v281_v26 = vpop.f32.mrf.mxu1 }
 0x19c   :  { %v246_v27 = vmul.f32 -1.442695, %v198_v25 }
 0x19e   :  { %293 = vpow2.f32 %v246_v27 }
 0x1ab   :  { %v294_v28 = vpop.eup %293 }
 0x1ac   :  { %v204_v29 = vadd.f32 1.0, %v294_v28 }
 0x1ae   :  { %295 = vrcp.f32 %v204_v29 }
 0x1bb   :  { %v296_v30 = vpop.eup %295 }
 0x1bc   :  { %214 = vrot.lane.b32.xlu1 %v296_v30, %s300_s2  ;;  %210 = vrot.lane.b32.xlu0 %v296_v30, %s301_s4  ;;  %208 = vst.msk [vmem:[%s410_s5] sm:$0x1] %vm207_vm3, %v296_v30 }
 0x1c0   :  { %218 = vrot.lane.b32.xlu1 %v296_v30, %s302_s16  ;;  %222 = vrot.lane.b32.xlu0 %v296_v30, %s303_s17 }
 0x1c4   :  { %226 = vrot.lane.b32.xlu1 %v296_v30, %s304_s18  ;;  %230 = vrot.lane.b32.xlu0 %v296_v30, %s305_s19 }
 0x1c8   :  { %234 = vrot.lane.b32.xlu1 %v296_v30, %s306_s20 }
 0x22e   :  { %v215_v31 = vpop.permute.xlu1 %214  ;;  %v211_v32 = vpop.permute.xlu0 %210 }
 0x22f   :  { %217 = vst.msk [vmem:[%s410_s5 + $0x2] sm:$0x1] %vm207_vm3, %v215_v31  ;;  %213 = vst.msk [vmem:[%s410_s5 + $0x1] sm:$0x1] %vm207_vm3, %v211_v32 }
 0x232   :  { %v219_v33 = vpop.permute.xlu1 %218  ;;  %v223_v34 = vpop.permute.xlu0 %222 }
 0x233   :  { %221 = vst.msk [vmem:[%s410_s5 + $0x3] sm:$0x1] %vm207_vm3, %v219_v33  ;;  %225 = vst.msk [vmem:[%s410_s5 + $0x4] sm:$0x1] %vm207_vm3, %v223_v34 }
 0x236   :  { %v227_v35 = vpop.permute.xlu1 %226  ;;  %v231_v36 = vpop.permute.xlu0 %230 }
 0x237   :  { %229 = vst.msk [vmem:[%s410_s5 + $0x5] sm:$0x1] %vm207_vm3, %v227_v35  ;;  %233 = vst.msk [vmem:[%s410_s5 + $0x6] sm:$0x1] %vm207_vm3, %v231_v36 }
 0x23a   :  { %v235_v37 = vpop.permute.xlu1 %234 }
 0x23b   :  { %237 = vst.msk [vmem:[%s410_s5 + $0x7] sm:$0x1] %vm207_vm3, %v235_v37 }

</bundles_post_ra>
